<compile_context>
chip_gen: v6e
topology: v6e:2x2x1
jax: 0.10.0
libtpu: 0.0.40
codegen_flags: <defaults>
</compile_context>

<pallas_src>
import jax
import jax.numpy as jnp
from jax.experimental import pallas as pl
from jax.experimental.pallas import tpu as pltpu


def _identity_kernel(x_ref, o_ref):
    # Whole-tile VMEM copy (the "forward" of the abstract Module).
    o_ref[...] = x_ref[...]


def _sublane_multiple(dtype) -> int:
    # Sub-32-bit dtypes pack along sublanes: 8 (f32), 16 (bf16), 32 (int8/fp8).
    itemsize = jnp.dtype(dtype).itemsize
    return 8 * max(1, 4 // itemsize)


def _choose_layout(n_elems: int, dtype):
    """Pick a lane-dense (rows, lanes) layout and a ~4 MiB row tile."""
    itemsize = jnp.dtype(dtype).itemsize
    sub = _sublane_multiple(dtype)

    # Lane width: largest multiple of 128 (up to 1024) that still yields at
    # least 2*sub rows, so small inputs stay well formed.
    lanes = 1024
    while lanes > 128 and n_elems < lanes * 2 * sub:
        lanes //= 2

    rows = pl.cdiv(n_elems, lanes)
    padded = rows * lanes

    # ~4 MiB per block (v7x-safe: 4 double-buffered copies ~16 MiB << 64 MiB),
    # rounded to the sublane packing multiple.
    target_bytes = 4 * 1024 * 1024
    tile_rows = max(sub, (target_bytes // (lanes * itemsize)) // sub * sub)
    tile_rows = min(tile_rows, rows)

    # Ensure >= 2 grid steps when possible so 'parallel' can shard the copy
    # across the two TensorCores of a v7x chip.
    if tile_rows == rows and rows >= 2 * sub:
        tile_rows = pl.cdiv(pl.cdiv(rows, 2), sub) * sub

    return lanes, rows, padded, tile_rows


@jax.jit
def module_forward(x: jax.Array) -> jax.Array:
    """Identity forward pass of the abstract Module, as a Pallas kernel.

    Accepts any shape (the trainer feeds arbitrary subclass inputs); values,
    shape and dtype are preserved exactly.
    """
    orig_shape = x.shape
    n = x.size
    lanes, rows, padded, tile_rows = _choose_layout(n, x.dtype)

    flat = x.reshape(-1)
    if padded != n:
        flat = jnp.pad(flat, (0, padded - n))
    x2d = flat.reshape(rows, lanes)

    itemsize = jnp.dtype(x.dtype).itemsize
    tile_bytes = tile_rows * lanes * itemsize
    # 2 input + 2 output double-buffers of the tile, plus headroom.
    vmem_limit = int(max(16 * 1024 * 1024, 4 * tile_bytes + 4 * 1024 * 1024))

    grid = (pl.cdiv(rows, tile_rows),)

    out2d = pl.pallas_call(
        _identity_kernel,
        out_shape=jax.ShapeDtypeStruct((rows, lanes), x.dtype),
        grid=grid,
        in_specs=[pl.BlockSpec((tile_rows, lanes), lambda i: (i, 0))],
        out_specs=pl.BlockSpec((tile_rows, lanes), lambda i: (i, 0)),
        input_output_aliases={0: 0},
        compiler_params=pltpu.CompilerParams(
            dimension_semantics=("parallel",),
            vmem_limit_bytes=vmem_limit,
        ),
    )(x2d)

    out_flat = out2d.reshape(-1)
    if padded != n:
        out_flat = out_flat[:n]
    return out_flat.reshape(orig_shape)


if __name__ == "__main__":
    key = jax.random.PRNGKey(0)

    # Small NCHW example consistent with what the trainer would feed forward().
    x = jax.random.normal(key, (2, 4, 16, 16), dtype=jnp.float32)
    y = module_forward(x)
    jax.block_until_ready(y)
    assert y.shape == x.shape and y.dtype == x.dtype
    assert bool(jnp.allclose(y, x))

    # Extra check: non-lane-divisible element count exercises the pad/unpad path.
    x_odd = jax.random.normal(jax.random.PRNGKey(1), (3, 5, 7, 9), dtype=jnp.float32)
    y_odd = module_forward(x_odd)
    jax.block_until_ready(y_odd)
    assert y_odd.shape == x_odd.shape and bool(jnp.allclose(y_odd, x_odd))

    print("KERNEL_OK")
</pallas_src>

<mosaic_0001>
module attributes {stable_mosaic.version = 11 : i64} {
  func.func @_identity_kernel(%arg0: i32, %arg1: memref<8x128xf32, #tpu.memory_space<vmem>>, %arg2: memref<8x128xf32, #tpu.memory_space<vmem>>) attributes {dimension_semantics = [#tpu.dimension_semantics<parallel>], iteration_bounds = array<i64: 2>, scalar_prefetch = 0 : i64, scratch_operands = 0 : i64, tpu.core_type = #tpu.core_type<tc>, window_params = [{transform_indices = @transform_0, window_bounds = array<i64: 8, 128>}, {transform_indices = @transform_1, window_bounds = array<i64: 8, 128>}]} {
    %c0 = arith.constant 0 : index
    %c0_0 = arith.constant 0 : index
    %0 = vector.load %arg1[%c0, %c0_0] : memref<8x128xf32, #tpu.memory_space<vmem>>, vector<8x128xf32>
    %c0_1 = arith.constant 0 : index
    %c0_2 = arith.constant 0 : index
    %1 = vector.load %arg2[%c0_1, %c0_2] : memref<8x128xf32, #tpu.memory_space<vmem>>, vector<8x128xf32>
    tpu.vector_store %arg2[%c0_1, %c0_2], %0 {strides = array<i32>} : memref<8x128xf32, #tpu.memory_space<vmem>>, vector<8x128xf32>,
    return
  }
  func.func @transform_0(%arg0: i32) -> (i32, i32) {
    %c0_i32 = arith.constant 0 : i32
    %c0_i32_0 = arith.constant 0 : i32
    return %arg0, %c0_i32 : i32, i32
  }
  func.func @transform_1(%arg0: i32) -> (i32, i32) {
    %c0_i32 = arith.constant 0 : i32
    %c0_i32_0 = arith.constant 0 : i32
    return %arg0, %c0_i32 : i32, i32
  }
}

</mosaic_0001>

<bundles_post_ra>
// kernel: module_forward.1
= control target key start
LH: loop header
LB: loop body
LE: loop exit
PB: predicated region body
PF: predicated region fallthrough
CT: control target
= control target key end

     0   :  { %s188_s6 = smov 0   ;;  %s208_s0 = inlined_call_operand.vmem [shape: f32[16,128], index: 0, kind: input, shape index: {}, may-alias: {0,1}]   ;;  %s209_s1 = inlined_call_operand.vmem [shape: f32[16,128], index: 1, kind: output, shape index: {}, may-alias: {0,1}]  }
   0x1 LB: > { %s167_s7 = sadd.s32 4294967295, %s190_s6   ;;  %p171_p0 = scmp.ge.s32.totalorder %s190_s6, 1  ;;  %s190_s6 = sphi %s188_s6, %s11_s6  }
   0x2   : > { %p86_p1 = scmp.lt.s32.totalorder %s190_s6, 3 }
   0x4   : > { %p87_p2 = pnand %p171_p0, %p86_p1 }
   0x5   : > { %p104_p3 = scmp.lt.s32.totalorder (!%p87_p2), %s167_s7, 1 }
   0x6   : > { %90 = sbr.rel (%p87_p2) target bundleno = 16 (0x10), region = 24 }
   0xb   : > { %s211_s7 = smov (!%p104_p3, %s167_s7), 1 }
   0xc   : > { %s172_s8 = sshll.u32 %s211_s7, 3 }
   0xd   : > { %s107_s11 = scalar_lea.vmem %s208_s0, %s172_s8  ;;  %s111_s14 = scalar_lea.vmem %s209_s1, %s172_s8 }
   0xe   : > { %v112_v0 = vld [vmem:[%s107_s11] sm:$0xff] }
   0xf   : > { %113 = vst [vmem:[%s111_s14] sm:$0xff] %v112_v0 }
  0x10 PF: > { %s11_s6 = sadd.s32 1, %s190_s6  }
  0x11   : > { %p8_p4 = scmp.ge.s32.totalorder %s11_s6, 4  }
  0x13   :  { %10 = sbr.rel (!%p8_p4) target bundleno = 1 (0x1), region = 54 }

</bundles_post_ra>
